<compile_context>
chip_gen: v5e
topology: v5e:2x2
jax: 0.10.0
libtpu: 0.0.40
codegen_flags: <defaults>
</compile_context>

<pallas_src>
import jax
import jax.numpy as jnp
from jax import lax
from jax.experimental import pallas as pl
from jax.experimental.pallas import tpu as pltpu

IN_F = 32
OUT_F = 32
LANES = 128
PACK = LANES // IN_F            # 4 logical rows per lane-dense packed row
_TILE_ROWS_CAP = 2048           # packed rows per tile: (2048,128) f32 = 1 MiB
_SMALL_PATH_MAX_ROWS = 2048     # <= this many packed rows -> single-block path


def _round_up(x: int, m: int) -> int:
    return ((x + m - 1) // m) * m


def _modify_by_lambda_kernel(x_ref, w_ref, b_ref, o_ref):
    # x_ref : (tile_rows, 128)  VMEM   lane-dense packed activations
    # w_ref : (128, 128)        VMEM   block-diagonal weight, fn already folded in
    # b_ref : (1, 128)          VMEM   tiled bias, fn already folded in
    # o_ref : (tile_rows, 128)  VMEM
    y = lax.dot_general(
        x_ref[...], w_ref[...],
        dimension_numbers=(((1,), (1,)), ((), ())),   # x @ W128^T on the MXU
        preferred_element_type=jnp.float32,
    )
    o_ref[...] = (y + b_ref[...]).astype(o_ref.dtype)  # f32 epilogue, then cast


def modify_by_lambda(x: jax.Array, weight: jax.Array, bias: jax.Array,
                     *, small_path_max_rows: int = _SMALL_PATH_MAX_ROWS,
                     tile_rows_cap: int = _TILE_ROWS_CAP) -> jax.Array:
    """fn(module(x)) with module = Linear(weight, bias), fn = 2*t.

    x      : [B, IN_F]
    weight : [OUT_F, IN_F]  (PyTorch nn.Linear layout, passed unchanged)
    bias   : [OUT_F]
    """
    B, in_f = x.shape
    out_f = weight.shape[0]
    assert in_f == IN_F and out_f == OUT_F and LANES % in_f == 0

    # --- parameter prep (would be done once per module in real use) ---------
    # Block-diagonal repack + fold fn (2*t) into the parameters.
    w128 = 2.0 * jnp.kron(jnp.eye(PACK, dtype=weight.dtype), weight)   # [128,128]
    b128 = (2.0 * jnp.tile(bias, (PACK,))).reshape(1, LANES)           # [1,128]

    # --- lane-dense repack of the activations --------------------------------
    b_pad4 = _round_up(B, PACK)
    if b_pad4 != B:
        x = jnp.pad(x, ((0, b_pad4 - B), (0, 0)))
    rows = b_pad4 // PACK
    xp = x.reshape(rows, LANES)

    if rows <= small_path_max_rows:
        # Small/medium: whole problem fits comfortably in VMEM.  Single block,
        # no grid / pipelining machinery.
        out_p = pl.pallas_call(
            _modify_by_lambda_kernel,
            out_shape=jax.ShapeDtypeStruct((rows, LANES), x.dtype),
            in_specs=[
                pl.BlockSpec(memory_space=pltpu.MemorySpace.VMEM),
                pl.BlockSpec(memory_space=pltpu.MemorySpace.VMEM),
                pl.BlockSpec(memory_space=pltpu.MemorySpace.VMEM),
            ],
            out_specs=pl.BlockSpec(memory_space=pltpu.MemorySpace.VMEM),
        )(xp, w128, b128)
    else:
        # Large batch: tile the packed-row axis.  Tile capped for v7x's smaller
        # VMEM and chosen so the grid has >= 2 steps for megacore sharding.
        tile = min(tile_rows_cap, _round_up(pl.cdiv(rows, 2), 8))
        rows_pad = _round_up(rows, tile)
        if rows_pad != rows:
            xp = jnp.pad(xp, ((0, rows_pad - rows), (0, 0)))
        grid = (rows_pad // tile,)
        out_p = pl.pallas_call(
            _modify_by_lambda_kernel,
            out_shape=jax.ShapeDtypeStruct((rows_pad, LANES), x.dtype),
            grid=grid,
            in_specs=[
                pl.BlockSpec((tile, LANES), lambda i: (i, 0)),
                pl.BlockSpec((LANES, LANES), lambda i: (0, 0)),   # resident
                pl.BlockSpec((1, LANES), lambda i: (0, 0)),       # resident
            ],
            out_specs=pl.BlockSpec((tile, LANES), lambda i: (i, 0)),
            compiler_params=pltpu.CompilerParams(
                dimension_semantics=("parallel",),
                vmem_limit_bytes=32 * 1024 * 1024,   # safe on v5e/v6e/v7x; tiles are ~1 MiB
            ),
        )(xp, w128, b128)
        out_p = out_p[:rows]

    # Unpack back to [B, OUT_F].
    return out_p.reshape(b_pad4, OUT_F)[:B]


if __name__ == "__main__":
    key = jax.random.PRNGKey(0)
    kw, kb, k1, k2, k3 = jax.random.split(key, 5)

    # Deterministic synthetic Linear parameters (PyTorch layout: weight [out, in]).
    weight = jax.random.normal(kw, (OUT_F, IN_F), dtype=jnp.float32) * 0.1
    bias = jax.random.normal(kb, (OUT_F,), dtype=jnp.float32) * 0.1

    def ref(xx):
        return 2.0 * (xx @ weight.T + bias[None, :])

    # --- tiny batch, exercises row padding to the repack factor (B=6) -------
    x_a = jax.random.normal(k1, (6, IN_F), dtype=jnp.float32)
    out_a = jax.block_until_ready(modify_by_lambda(x_a, weight, bias))
    assert out_a.shape == (6, OUT_F)
    assert jnp.allclose(out_a, ref(x_a), atol=1e-5, rtol=1e-5)

    # --- medium batch, single-block lane-dense path --------------------------
    x_b = jax.random.normal(k2, (1024, IN_F), dtype=jnp.float32)
    out_b = jax.block_until_ready(modify_by_lambda(x_b, weight, bias))
    assert out_b.shape == (1024, OUT_F)
    assert jnp.allclose(out_b, ref(x_b), atol=1e-4, rtol=1e-4)

    # --- force the tiled-grid ("parallel") path at small shapes --------------
    x_c = jax.random.normal(k3, (1000, IN_F), dtype=jnp.float32)
    out_c = jax.block_until_ready(
        modify_by_lambda(x_c, weight, bias, small_path_max_rows=0, tile_rows_cap=64))
    assert out_c.shape == (1000, OUT_F)
    assert jnp.allclose(out_c, ref(x_c), atol=1e-4, rtol=1e-4)

    print("KERNEL_OK")
</pallas_src>

<mosaic_0001>
module attributes {stable_mosaic.version = 11 : i64} {
  func.func @_modify_by_lambda_kernel(%arg0: memref<2x128xf32, #tpu.memory_space<vmem>>, %arg1: memref<128x128xf32, #tpu.memory_space<vmem>>, %arg2: memref<1x128xf32, #tpu.memory_space<vmem>>, %arg3: memref<2x128xf32, #tpu.memory_space<vmem>>) attributes {dimension_semantics = [], scalar_prefetch = 0 : i64, scratch_operands = 0 : i64, tpu.core_type = #tpu.core_type<tc>} {
    %c0 = arith.constant 0 : index
    %c0_0 = arith.constant 0 : index
    %0 = vector.load %arg0[%c0, %c0_0] : memref<2x128xf32, #tpu.memory_space<vmem>>, vector<2x128xf32>
    %c0_1 = arith.constant 0 : index
    %c0_2 = arith.constant 0 : index
    %1 = vector.load %arg1[%c0_1, %c0_2] : memref<128x128xf32, #tpu.memory_space<vmem>>, vector<128x128xf32>
    %cst = arith.constant dense<0.000000e+00> : vector<2x128xf32>
    %2 = tpu.matmul %0, %1, %cst {dimension_numbers = #tpu.dot_dimension_numbers<[1], [1], [0], [0], [0, 0, 1, 0], [], []>} : vector<2x128xf32>, vector<128x128xf32>, vector<2x128xf32> -> vector<2x128xf32>
    %c0_3 = arith.constant 0 : index
    %c0_4 = arith.constant 0 : index
    %3 = vector.load %arg2[%c0_3, %c0_4] : memref<1x128xf32, #tpu.memory_space<vmem>>, vector<1x128xf32>
    %4 = vector.broadcast %3 : vector<1x128xf32> to vector<2x128xf32>
    %5 = arith.addf %2, %4 : vector<2x128xf32>
    %c0_5 = arith.constant 0 : index
    %c0_6 = arith.constant 0 : index
    %6 = vector.load %arg3[%c0_5, %c0_6] : memref<2x128xf32, #tpu.memory_space<vmem>>, vector<2x128xf32>
    tpu.vector_store %arg3[%c0_5, %c0_6], %5 {strides = array<i32>} : memref<2x128xf32, #tpu.memory_space<vmem>>, vector<2x128xf32>,
    return
  }
}

</mosaic_0001>

<bundles_post_ra>
// kernel: tpu_custom_call.1
= control target key start
LH: loop header
LB: loop body
LE: loop exit
PB: predicated region body
PF: predicated region fallthrough
CT: control target
= control target key end

     0   :  { %8 = vsyncpa [#allocation3], 0  ;;  %s226_s0 = inlined_call_operand.hbm [shape: f32[2,128], index: 0, kind: input, shape index: {}]   ;;  %s227_s1 = inlined_call_operand.hbm [shape: f32[128,128], index: 1, kind: input, shape index: {}]   ;;  %s228_s2 = inlined_call_operand.vmem [shape: f32[1,128], index: 2, kind: input, shape index: {}]   ;;  %s229_s3 = inlined_call_operand.hbm [shape: f32[2,128], index: 3, kind: output, shape index: {}]  }
   0x1   :  { %9 = vsyncpa [#allocation6], 0 }
   0x2   :  { %10 = vsyncpa [#allocation4], 0  ;;  %s16_s14 = sshll.u32 %s226_s0, 4  ;;  %s189_s15 = smov [#allocation2]   ;;  %s17_s14 = int_to_ptr.hbm [resolvable:$true] %s16_s14 }
   0x3   :  { %s18_s16 = sshll.u32 %s189_s15, 4  ;;  %s26_s19 = sshll.u32 %s227_s1, 4  ;;  %s19_s16 = int_to_ptr.vmem [resolvable:$true] %s18_s16  ;;  %s27_s19 = int_to_ptr.hbm [resolvable:$true] %s26_s19 }
   0x4   :  { %21 = dma.hbm_to_vmem [thread:$0]  %s17_s14, 32, %s19_s16, [#allocation3]  }
   0x5   :  { %s190_s20 = smov [#allocation5]   ;;  %s191_s22 = smov 128  }
   0x6   :  { %s28_s21 = sshll.u32 %s190_s20, 4  ;;  %s192_s23 = smov 8   ;;  %s29_s21 = int_to_ptr.vmem [resolvable:$true] %s28_s21 }
   0x7   :  { %34 = dma.hbm_to_vmem [thread:$0]  %s27_s19, 2048, %s29_s21, [#allocation6], %s191_s22, %s191_s22, %s192_s23  }
   0x8   :  { %183 = dma.done.wait [#allocation3], 32  }
   0x9   :  { %184 = vsyncadd [#allocation3], 4294967264 }
   0xa   :  { %185 = dma.done.wait [#allocation6], 2048  }
   0xb   :  { %186 = vsyncadd [#allocation6], 4294965248  ;;  %v61_v0 = vld [vmem:[#allocation5 + $0x78] sm:$0xff]  ;;  %v60_v1 = vld [vmem:[#allocation5 + $0x70] sm:$0xff]  ;;  %s193_s24 = smov [#allocation7]   ;;  %s94_s28 = sshll.u32 %s229_s3, 4  ;;  %s95_s28 = int_to_ptr.hbm [resolvable:$true] %s94_s28 }
   0xc   :  { %66 = vmatpush.xpose.msra.mxu0 %v61_v0  ;;  %v59_v2 = vld [vmem:[#allocation5 + $0x68] sm:$0xff]  ;;  %v58_v3 = vld [vmem:[#allocation5 + $0x60] sm:$0xff]  ;;  %v57_v4 = vld [vmem:[#allocation5 + $0x58] sm:$0xff]  ;;  %s92_s25 = sshll.u32 %s193_s24, 4  ;;  %s93_s25 = int_to_ptr.vmem [resolvable:$true] %s92_s25 }
   0xd   :  { %v56_v5 = vld [vmem:[#allocation5 + $0x50] sm:$0xff]  ;;  %v55_v6 = vld [vmem:[#allocation5 + $0x48] sm:$0xff]  ;;  %v54_v7 = vld [vmem:[#allocation5 + $0x40] sm:$0xff] }
   0xe   :  { %v53_v8 = vld [vmem:[#allocation5 + $0x38] sm:$0xff]  ;;  %v52_v9 = vld [vmem:[#allocation5 + $0x30] sm:$0xff]  ;;  %v51_v10 = vld [vmem:[#allocation5 + $0x28] sm:$0xff] }
   0xf   :  { %v50_v11 = vld [vmem:[#allocation5 + $0x20] sm:$0xff]  ;;  %v49_v12 = vld [vmem:[#allocation5 + $0x18] sm:$0xff]  ;;  %v48_v13 = vld [vmem:[#allocation5 + $0x10] sm:$0xff] }
  0x10   :  { %67 = vmatpush.xpose.msra.mxu0 %v60_v1  ;;  %v47_v14 = vld [vmem:[#allocation5 + $0x8] sm:$0xff]  ;;  %v46_v15 = vld [vmem:[#allocation5] sm:$0xff]  ;;  %v45_v16 = vld [vmem:[#allocation2] sm:$0x3] }
  0x11   :  { %v110_v17 = vld [vmem:[%s228_s2] ss:$0 sm:$0xff] }
  0x14   :  { %68 = vmatpush.xpose.msra.mxu0 %v59_v2 }
  0x18   :  { %69 = vmatpush.xpose.msra.mxu0 %v58_v3 }
  0x1c   :  { %70 = vmatpush.xpose.msra.mxu0 %v57_v4 }
  0x20   :  { %71 = vmatpush.xpose.msra.mxu0 %v56_v5 }
  0x24   :  { %72 = vmatpush.xpose.msra.mxu0 %v55_v6 }
  0x28   :  { %73 = vmatpush.xpose.msra.mxu0 %v54_v7 }
  0x2c   :  { %74 = vmatpush.xpose.msra.mxu0 %v53_v8 }
  0x30   :  { %75 = vmatpush.xpose.msra.mxu0 %v52_v9 }
  0x34   :  { %76 = vmatpush.xpose.msra.mxu0 %v51_v10 }
  0x38   :  { %77 = vmatpush.xpose.msra.mxu0 %v50_v11 }
  0x3c   :  { %78 = vmatpush.xpose.msra.mxu0 %v49_v12 }
  0x40   :  { %79 = vmatpush.xpose.msra.mxu0 %v48_v13 }
  0x44   :  { %80 = vmatpush.xpose.msra.mxu0 %v47_v14 }
  0x48   :  { %81 = vmatpush.xpose.msra.mxu0 %v46_v15 }
  0x4b   :  { %82 = vmatmul.f32.vlgmr.msra.gmra.mxu0 %v45_v16 }
  0xc8   :  { %v83_v18 = vpop.f32.mrf.mxu0 }
  0xc9   :  { %v84_v19 = vadd.f32 %v110_v17, %v83_v18 }
  0xcb   :  { %86 = vst [vmem:[#allocation7] sm:$0x3] %v84_v19 }
  0xcc   :  { %97 = dma.vmem_to_hbm [thread:$0]  %s93_s25, 32, %s95_s28, [#allocation4]  }
  0xcd   :  { %187 = dma.done.wait [#allocation4], 32  }
  0xce   :  { %188 = vsyncadd [#allocation4], 4294967264 }
  0xcf   :  { %102 = vsyncpa [#allocation3], 1 }
  0xd0   :  { %103 = vsyncpa [#allocation6], 1 }
  0xd1   :  { %104 = vsyncpa [#allocation4], 1 }

</bundles_post_ra>
